<compile_context>
chip_gen: v7x
topology: tpu7x:2x2x1
jax: 0.10.0
libtpu: 0.0.40
codegen_flags: <defaults>
</compile_context>

<pallas_src>
import math

import jax
import jax.numpy as jnp
from jax.experimental import pallas as pl
from jax.experimental.pallas import tpu as pltpu

# ----------------------------- config (SwitchConfig, small) -----------------------------
VOCAB        = 64
D_MODEL      = 64
N_HEADS      = 4
D_KV         = D_MODEL // N_HEADS      # 16
INNER        = N_HEADS * D_KV          # 64
D_FF         = 128
N_LAYERS     = 2                       # encoder layers
N_DEC_LAYERS = 2                       # decoder layers
N_EXPERTS    = 4
N_BUCKETS    = 32
MAX_DIST     = 128
LN_EPS       = 1e-6
NEG          = -1e9                    # additive mask value

B     = 2
S_ENC = 16
S_DEC = 8


# ----------------------------- in-kernel helpers (traced) -----------------------------
def _rmsnorm(x, w):
    # T5LayerNorm: no mean subtraction, no bias
    var = jnp.mean(x * x, axis=-1, keepdims=True)
    return x * jax.lax.rsqrt(var + LN_EPS) * w


def _attend(q, k, v, bias_fn):
    # q: (Sq, INNER), k/v: (Sk, INNER); per-head loop keeps heads in the lane dim,
    # avoids reshapes/transposes; concat re-packs the 4x(Sq,16) outputs to (Sq,64).
    outs = []
    for h in range(N_HEADS):
        sl = slice(h * D_KV, (h + 1) * D_KV)
        qh, kh, vh = q[:, sl], k[:, sl], v[:, sl]
        # contract last dims directly (no explicit K transpose); T5: no 1/sqrt(dk) scaling
        s = jax.lax.dot_general(qh, kh, (((1,), (1,)), ((), ())),
                                preferred_element_type=jnp.float32)   # (Sq, Sk)
        s = s + bias_fn(h)
        s = s - jnp.max(s, axis=-1, keepdims=True)
        p = jnp.exp(s)
        p = p * pl.reciprocal(jnp.sum(p, axis=-1, keepdims=True), approx=True)
        outs.append(jnp.dot(p, vh, preferred_element_type=jnp.float32))  # (Sq, D_KV)
    return jnp.concatenate(outs, axis=-1)                                # (Sq, INNER)


# ----------------------------- fused Pallas kernels -----------------------------
def self_attn_block_kernel(x_ref, lnw_ref, wqkv_ref, wo_ref, pos_ref, mask_ref, o_ref):
    # one batch element per grid step; all heads processed inside the kernel
    x = x_ref[...].astype(jnp.float32)                                   # (Sq, D)
    xn = _rmsnorm(x, lnw_ref[...])
    qkv = jnp.dot(xn, wqkv_ref[...], preferred_element_type=jnp.float32)  # (Sq, 3*INNER)
    q = qkv[:, :INNER]
    k = qkv[:, INNER:2 * INNER]
    v = qkv[:, 2 * INNER:]
    mask = mask_ref[...]                                                  # (Sq, Sk)
    attn = _attend(q, k, v, lambda h: pos_ref[h] + mask)
    out = jnp.dot(attn, wo_ref[...], preferred_element_type=jnp.float32)  # (Sq, D)
    o_ref[...] = (x + out).astype(o_ref.dtype)                            # fused residual


def cross_attn_block_kernel(x_ref, enc_ref, lnw_ref, wq_ref, wkv_ref, wo_ref, mask_ref, o_ref):
    x = x_ref[...].astype(jnp.float32)                                    # (Sd, D)
    enc = enc_ref[...].astype(jnp.float32)                                # (Se, D)
    xn = _rmsnorm(x, lnw_ref[...])
    q = jnp.dot(xn, wq_ref[...], preferred_element_type=jnp.float32)      # (Sd, INNER)
    kv = jnp.dot(enc, wkv_ref[...], preferred_element_type=jnp.float32)   # (Se, 2*INNER)
    k = kv[:, :INNER]
    v = kv[:, INNER:]
    mask = mask_ref[...]                                                  # (Sd, Se)
    attn = _attend(q, k, v, lambda h: mask)   # standard T5: zero cross-attn positional bias
    out = jnp.dot(attn, wo_ref[...], preferred_element_type=jnp.float32)
    o_ref[...] = (x + out).astype(o_ref.dtype)


def ff_block_kernel(x_ref, lnw_ref, wi_ref, wo_ref, o_ref):
    # T5LayerFF: x + wo(relu(wi(rmsnorm(x))))
    x = x_ref[...].astype(jnp.float32)                                    # (T, D)
    xn = _rmsnorm(x, lnw_ref[...])
    h = jnp.maximum(jnp.dot(xn, wi_ref[...], preferred_element_type=jnp.float32), 0.0)
    y = jnp.dot(h, wo_ref[...], preferred_element_type=jnp.float32)
    o_ref[...] = (x + y).astype(o_ref.dtype)


def moe_block_kernel(x_ref, gate_ref, wi_ref, wo_ref, o_ref):
    # gate logits + softmax + top-1 routing + dense all-expert FFN + combine, all in VMEM.
    x = x_ref[...].astype(jnp.float32)                                    # (T, D)
    logits = jnp.dot(x, gate_ref[...], preferred_element_type=jnp.float32)  # (T, E)
    logits = logits - jnp.max(logits, axis=-1, keepdims=True)
    ex = jnp.exp(logits)
    probs = ex * pl.reciprocal(jnp.sum(ex, axis=-1, keepdims=True), approx=True)
    max_p = jnp.max(probs, axis=-1, keepdims=True)                        # (T, 1)
    e_idx = jax.lax.broadcasted_iota(jnp.int32, probs.shape, 1)           # (T, E)
    # first-index argmax via min-over-matching-indices (tie-break identical to argmax)
    top = jnp.min(jnp.where(probs >= max_p, e_idx, N_EXPERTS), axis=-1, keepdims=True)

    acc = jnp.zeros_like(x)
    for e in range(N_EXPERTS):
        coef = jnp.where(top == e, max_p, 0.0)                            # (T, 1)
        h = jnp.maximum(jnp.dot(x, wi_ref[e], preferred_element_type=jnp.float32), 0.0)
        y = jnp.dot(h, wo_ref[e], preferred_element_type=jnp.float32)
        acc = acc + coef * y
    # TODO(synk): dense all-expert compute (E x FLOPs); use scalar-prefetched gathered
    # dispatch if scaled beyond toy size.
    o_ref[...] = acc.astype(o_ref.dtype)


def rmsnorm_kernel(x_ref, w_ref, o_ref):
    o_ref[...] = _rmsnorm(x_ref[...].astype(jnp.float32), w_ref[...]).astype(o_ref.dtype)


# ----------------------------- Pallas wrappers -----------------------------
def fused_self_attn(x, p, pos_bias, mask_add):
    # x: (B, Sq, D), pos_bias: (H, Sq, Sk) shared across batch, mask_add: (B, Sq, Sk)
    Bq, Sq, D = x.shape
    Sk = mask_add.shape[-1]
    sq = pl.Squeezed()
    return pl.pallas_call(
        self_attn_block_kernel,
        out_shape=jax.ShapeDtypeStruct((Bq, Sq, D), jnp.float32),
        grid=(Bq,),
        in_specs=[
            pl.BlockSpec((sq, Sq, D), lambda b: (b, 0, 0)),
            pl.BlockSpec((1, D), lambda b: (0, 0)),
            pl.BlockSpec((D, 3 * INNER), lambda b: (0, 0)),
            pl.BlockSpec((INNER, D), lambda b: (0, 0)),
            pl.BlockSpec((N_HEADS, Sq, Sk), lambda b: (0, 0, 0)),
            pl.BlockSpec((sq, Sq, Sk), lambda b: (b, 0, 0)),
        ],
        out_specs=pl.BlockSpec((sq, Sq, D), lambda b: (b, 0, 0)),
        compiler_params=pltpu.CompilerParams(dimension_semantics=("parallel",)),
    )(x, p['ln'].reshape(1, D), p['wqkv'], p['wo'], pos_bias, mask_add)


def fused_cross_attn(x, enc_h, p, mask_add):
    # x: (B, Sd, D), enc_h: (B, Se, D), mask_add: (B, Sd, Se)
    Bq, Sd, D = x.shape
    Se = enc_h.shape[1]
    sq = pl.Squeezed()
    return pl.pallas_call(
        cross_attn_block_kernel,
        out_shape=jax.ShapeDtypeStruct((Bq, Sd, D), jnp.float32),
        grid=(Bq,),
        in_specs=[
            pl.BlockSpec((sq, Sd, D), lambda b: (b, 0, 0)),
            pl.BlockSpec((sq, Se, D), lambda b: (b, 0, 0)),
            pl.BlockSpec((1, D), lambda b: (0, 0)),
            pl.BlockSpec((D, INNER), lambda b: (0, 0)),
            pl.BlockSpec((D, 2 * INNER), lambda b: (0, 0)),
            pl.BlockSpec((INNER, D), lambda b: (0, 0)),
            pl.BlockSpec((sq, Sd, Se), lambda b: (b, 0, 0)),
        ],
        out_specs=pl.BlockSpec((sq, Sd, D), lambda b: (b, 0, 0)),
        compiler_params=pltpu.CompilerParams(dimension_semantics=("parallel",)),
    )(x, enc_h, p['ln'].reshape(1, D), p['wq'], p['wkv'], p['wo'], mask_add)


def fused_ff(x, p):
    Bq, S, D = x.shape
    T = Bq * S
    out = pl.pallas_call(
        ff_block_kernel,
        out_shape=jax.ShapeDtypeStruct((T, D), jnp.float32),
        grid=(1,),
        in_specs=[pl.BlockSpec((T, D), lambda i: (0, 0)),
                  pl.BlockSpec((1, D), lambda i: (0, 0)),
                  pl.BlockSpec((D, D_FF), lambda i: (0, 0)),
                  pl.BlockSpec((D_FF, D), lambda i: (0, 0))],
        out_specs=pl.BlockSpec((T, D), lambda i: (0, 0)),
    )(x.reshape(T, D), p['ln'].reshape(1, D), p['wi'], p['wo'])
    return out.reshape(Bq, S, D)


def fused_moe(x, p):
    # Reference MoE pipe applies the MoE directly to hidden states (no pre-LN, no residual).
    Bq, S, D = x.shape
    T = Bq * S
    out = pl.pallas_call(
        moe_block_kernel,
        out_shape=jax.ShapeDtypeStruct((T, D), jnp.float32),
        grid=(1,),
        in_specs=[pl.BlockSpec((T, D), lambda i: (0, 0)),
                  pl.BlockSpec((D, N_EXPERTS), lambda i: (0, 0)),
                  pl.BlockSpec((N_EXPERTS, D, D_FF), lambda i: (0, 0, 0)),
                  pl.BlockSpec((N_EXPERTS, D_FF, D), lambda i: (0, 0, 0))],
        out_specs=pl.BlockSpec((T, D), lambda i: (0, 0)),
    )(x.reshape(T, D), p['gate'], p['wi'], p['wo'])
    return out.reshape(Bq, S, D)


def pallas_rmsnorm(x2, w):
    T, D = x2.shape
    return pl.pallas_call(
        rmsnorm_kernel,
        out_shape=jax.ShapeDtypeStruct((T, D), jnp.float32),
        grid=(1,),
        in_specs=[pl.BlockSpec((T, D), lambda i: (0, 0)),
                  pl.BlockSpec((1, D), lambda i: (0, 0))],
        out_specs=pl.BlockSpec((T, D), lambda i: (0, 0)),
    )(x2, w.reshape(1, D))


# ----------------------------- JAX glue (rel-pos bias / masks) -----------------------------
def relative_position_bucket(rel_pos, bidirectional, num_buckets, max_distance):
    relative_buckets = jnp.zeros_like(rel_pos)
    if bidirectional:
        num_buckets //= 2
        relative_buckets = relative_buckets + (rel_pos > 0).astype(jnp.int32) * num_buckets
        rel_pos = jnp.abs(rel_pos)
    else:
        rel_pos = -jnp.minimum(rel_pos, 0)
    max_exact = num_buckets // 2
    is_small = rel_pos < max_exact
    rp_f = jnp.maximum(rel_pos, 1).astype(jnp.float32)
    val_if_large = max_exact + (
        jnp.log(rp_f / max_exact) / math.log(max_distance / max_exact)
        * (num_buckets - max_exact)
    ).astype(jnp.int32)
    val_if_large = jnp.minimum(val_if_large, num_buckets - 1)
    return relative_buckets + jnp.where(is_small, rel_pos, val_if_large)


def compute_rel_bias(table, q_len, k_len, bidirectional):
    ctx = jnp.arange(q_len)[:, None]
    mem = jnp.arange(k_len)[None, :]
    rel = mem - ctx
    buckets = relative_position_bucket(rel, bidirectional, N_BUCKETS, MAX_DIST)
    values = table[buckets]                        # (q, k, H)
    return jnp.transpose(values, (2, 0, 1))        # (H, q, k) -- shared across batch


# ----------------------------- full model forward -----------------------------
def switch_forward(params, enc_ids, enc_mask, dec_ids, dec_mask):
    Bq, Se = enc_ids.shape
    _, Sd = dec_ids.shape

    # ---------- encoder ----------
    h_enc = jnp.take(params['enc_embed'], enc_ids, axis=0)            # (B, Se, D)
    enc_mask_add = jnp.broadcast_to(
        ((1.0 - enc_mask) * NEG)[:, None, :], (Bq, Se, Se))           # (B, Se, Se)

    enc_pos = None
    for i in range(N_LAYERS):
        p = params['enc'][i]
        if i == 0:   # has_relative_attention_bias on layer 0 only; bias reused by later layers
            enc_pos = compute_rel_bias(p['rel_bias'], Se, Se, bidirectional=True)
        h_enc = fused_self_attn(h_enc, p['attn'], enc_pos, enc_mask_add)
        if i % 2 == 0:
            h_enc = fused_ff(h_enc, p['ff'])
        else:
            h_enc = fused_moe(h_enc, p['moe'])
    h_enc = pallas_rmsnorm(h_enc.reshape(Bq * Se, D_MODEL),
                           params['enc_final_ln']).reshape(Bq, Se, D_MODEL)

    # ---------- decoder ----------
    h_dec = jnp.take(params['dec_embed'], dec_ids, axis=0)            # (B, Sd, D)
    causal = jnp.tril(jnp.ones((Sd, Sd), jnp.float32))
    dec_comb = dec_mask[:, None, :] * causal[None, :, :]              # (B, Sd, Sd)
    dec_mask_add = (1.0 - dec_comb) * NEG
    # TODO(synk): reference seeds encoder_decoder_position_bias with the (shape-incompatible)
    # encoder self-attn bias; standard T5 zero cross-attn bias + inverted encoder padding mask used.
    cross_mask_add = jnp.broadcast_to(
        ((1.0 - enc_mask) * NEG)[:, None, :], (Bq, Sd, Se))           # (B, Sd, Se)

    dec_pos = None
    for i in range(N_DEC_LAYERS):
        p = params['dec'][i]
        if i == 0:
            dec_pos = compute_rel_bias(p['rel_bias'], Sd, Sd, bidirectional=False)
        h_dec = fused_self_attn(h_dec, p['self_attn'], dec_pos, dec_mask_add)
        h_dec = fused_cross_attn(h_dec, h_enc, p['cross_attn'], cross_mask_add)
        if i % 2 == 0:
            h_dec = fused_ff(h_dec, p['ff'])
        else:
            h_dec = fused_moe(h_dec, p['moe'])
    h_dec = pallas_rmsnorm(h_dec.reshape(Bq * Sd, D_MODEL),
                           params['dec_final_ln']).reshape(Bq, Sd, D_MODEL)
    return h_dec


# ----------------------------- deterministic parameter init -----------------------------
def build_params(key):
    counter = [0]
    keys = jax.random.split(key, 256)

    def nxt():
        k = keys[counter[0]]
        counter[0] += 1
        return k

    def nrm(shape, scale=0.02):
        return jax.random.normal(nxt(), shape, jnp.float32) * scale

    def self_attn_params():
        wq, wk, wv = nrm((D_MODEL, INNER)), nrm((D_MODEL, INNER)), nrm((D_MODEL, INNER))
        return dict(ln=jnp.ones((D_MODEL,), jnp.float32),
                    wqkv=jnp.concatenate([wq, wk, wv], axis=1),   # (D, 3*INNER)
                    wo=nrm((INNER, D_MODEL)))

    def cross_attn_params():
        wq, wk, wv = nrm((D_MODEL, INNER)), nrm((D_MODEL, INNER)), nrm((D_MODEL, INNER))
        return dict(ln=jnp.ones((D_MODEL,), jnp.float32),
                    wq=wq,
                    wkv=jnp.concatenate([wk, wv], axis=1),        # (D, 2*INNER)
                    wo=nrm((INNER, D_MODEL)))

    def ff_params():
        return dict(ln=jnp.ones((D_MODEL,), jnp.float32),
                    wi=nrm((D_MODEL, D_FF)), wo=nrm((D_FF, D_MODEL)))

    def moe_params():
        return dict(gate=nrm((D_MODEL, N_EXPERTS)),
                    wi=nrm((N_EXPERTS, D_MODEL, D_FF)),
                    wo=nrm((N_EXPERTS, D_FF, D_MODEL)))

    params = dict(
        enc_embed=nrm((VOCAB, D_MODEL), 1.0),
        dec_embed=nrm((VOCAB, D_MODEL), 1.0),
        enc_final_ln=jnp.ones((D_MODEL,), jnp.float32),
        dec_final_ln=jnp.ones((D_MODEL,), jnp.float32),
        enc=[], dec=[],
    )
    for i in range(N_LAYERS):
        lyr = dict(attn=self_attn_params())
        if i == 0:
            lyr['rel_bias'] = nrm((N_BUCKETS, N_HEADS))
        if i % 2 == 0:
            lyr['ff'] = ff_params()
        else:
            lyr['moe'] = moe_params()
        params['enc'].append(lyr)
    for i in range(N_DEC_LAYERS):
        lyr = dict(self_attn=self_attn_params(), cross_attn=cross_attn_params())
        if i == 0:
            lyr['rel_bias'] = nrm((N_BUCKETS, N_HEADS))
        if i % 2 == 0:
            lyr['ff'] = ff_params()
        else:
            lyr['moe'] = moe_params()
        params['dec'].append(lyr)
    return params


# ----------------------------- main -----------------------------
if __name__ == "__main__":
    key = jax.random.PRNGKey(0)
    k_p, k1, k2 = jax.random.split(key, 3)
    params = build_params(k_p)

    enc_ids = jax.random.randint(k1, (B, S_ENC), 0, VOCAB, dtype=jnp.int32)
    dec_ids = jax.random.randint(k2, (B, S_DEC), 0, VOCAB, dtype=jnp.int32)
    # attention masks: last 2 encoder / last 1 decoder positions padded
    enc_mask = jnp.concatenate(
        [jnp.ones((B, S_ENC - 2), jnp.float32), jnp.zeros((B, 2), jnp.float32)], axis=1)
    dec_mask = jnp.concatenate(
        [jnp.ones((B, S_DEC - 1), jnp.float32), jnp.zeros((B, 1), jnp.float32)], axis=1)

    out = switch_forward(params, enc_ids, enc_mask, dec_ids, dec_mask)
    out = jax.block_until_ready(out)
    assert out.shape == (B, S_DEC, D_MODEL)
    assert bool(jnp.all(jnp.isfinite(out)))
    print("KERNEL_OK")
</pallas_src>

<mosaic_0001>
module attributes {stable_mosaic.version = 11 : i64} {
  func.func @self_attn_block_kernel(%arg0: i32, %arg1: memref<1x16x64xf32, #tpu.memory_space<vmem>>, %arg2: memref<1x64xf32, #tpu.memory_space<vmem>>, %arg3: memref<64x192xf32, #tpu.memory_space<vmem>>, %arg4: memref<64x64xf32, #tpu.memory_space<vmem>>, %arg5: memref<4x16x16xf32, #tpu.memory_space<vmem>>, %arg6: memref<1x16x16xf32, #tpu.memory_space<vmem>>, %arg7: memref<1x16x64xf32, #tpu.memory_space<vmem>>) attributes {dimension_semantics = [#tpu.dimension_semantics<parallel>], iteration_bounds = array<i64: 2>, scalar_prefetch = 0 : i64, scratch_operands = 0 : i64, tpu.core_type = #tpu.core_type<tc>, window_params = [{transform_indices = @transform_0, window_bounds = array<i64: 1, 16, 64>}, {pipeline_mode = #tpu.pipeline_mode<synchronous>, transform_indices = @transform_1, window_bounds = array<i64: 1, 64>}, {pipeline_mode = #tpu.pipeline_mode<synchronous>, transform_indices = @transform_2, window_bounds = array<i64: 64, 192>}, {pipeline_mode = #tpu.pipeline_mode<synchronous>, transform_indices = @transform_3, window_bounds = array<i64: 64, 64>}, {pipeline_mode = #tpu.pipeline_mode<synchronous>, transform_indices = @transform_4, window_bounds = array<i64: 4, 16, 16>}, {transform_indices = @transform_5, window_bounds = array<i64: 1, 16, 16>}, {transform_indices = @transform_6, window_bounds = array<i64: 1, 16, 64>}]} {
    %c0 = arith.constant 0 : index
    %c0_0 = arith.constant 0 : index
    %c0_1 = arith.constant 0 : index
    %0 = vector.load %arg1[%c0, %c0_0, %c0_1] : memref<1x16x64xf32, #tpu.memory_space<vmem>>, vector<1x16x64xf32>
    %1 = vector.shape_cast %0 : vector<1x16x64xf32> to vector<16x64xf32>
    %c0_2 = arith.constant 0 : index
    %c0_3 = arith.constant 0 : index
    %2 = vector.load %arg2[%c0_2, %c0_3] : memref<1x64xf32, #tpu.memory_space<vmem>>, vector<1x64xf32>
    %3 = arith.mulf %1, %1 : vector<16x64xf32>
    %cst = arith.constant dense<0.000000e+00> : vector<16xf32>
    %4 = vector.multi_reduction <add>, %3, %cst [1] : vector<16x64xf32> to vector<16xf32>
    %5 = vector.shape_cast %4 : vector<16xf32> to vector<16x1xf32>
    %cst_4 = arith.constant 6.400000e+01 : f32
    %6 = vector.broadcast %cst_4 : f32 to vector<16x1xf32>
    %7 = arith.divf %5, %6 : vector<16x1xf32>
    %cst_5 = arith.constant 9.99999997E-7 : f32
    %8 = vector.broadcast %cst_5 : f32 to vector<16x1xf32>
    %9 = arith.addf %7, %8 : vector<16x1xf32>
    %10 = math.rsqrt %9 : vector<16x1xf32>
    %11 = vector.broadcast %10 : vector<16x1xf32> to vector<16x64xf32>
    %12 = arith.mulf %1, %11 : vector<16x64xf32>
    %13 = vector.broadcast %2 : vector<1x64xf32> to vector<16x64xf32>
    %14 = arith.mulf %12, %13 : vector<16x64xf32>
    %c0_6 = arith.constant 0 : index
    %c0_7 = arith.constant 0 : index
    %15 = vector.load %arg3[%c0_6, %c0_7] : memref<64x192xf32, #tpu.memory_space<vmem>>, vector<64x192xf32>
    %cst_8 = arith.constant dense<0.000000e+00> : vector<16x192xf32>
    %16 = tpu.matmul %14, %15, %cst_8 {dimension_numbers = #tpu.dot_dimension_numbers<[1], [0], [0], [1], [0, 0, 1, 1], [], []>} : vector<16x64xf32>, vector<64x192xf32>, vector<16x192xf32> -> vector<16x192xf32>
    %17 = vector.extract_strided_slice %16 {offsets = [0, 0], sizes = [16, 64], strides = [1, 1]} : vector<16x192xf32> to vector<16x64xf32>
    %18 = vector.extract_strided_slice %16 {offsets = [0, 64], sizes = [16, 64], strides = [1, 1]} : vector<16x192xf32> to vector<16x64xf32>
    %19 = vector.extract_strided_slice %16 {offsets = [0, 128], sizes = [16, 64], strides = [1, 1]} : vector<16x192xf32> to vector<16x64xf32>
    %c0_9 = arith.constant 0 : index
    %c0_10 = arith.constant 0 : index
    %c0_11 = arith.constant 0 : index
    %20 = vector.load %arg6[%c0_9, %c0_10, %c0_11] : memref<1x16x16xf32, #tpu.memory_space<vmem>>, vector<1x16x16xf32>
    %21 = vector.shape_cast %20 : vector<1x16x16xf32> to vector<16x16xf32>
    %22 = vector.extract_strided_slice %17 {offsets = [0, 0], sizes = [16, 16], strides = [1, 1]} : vector<16x64xf32> to vector<16x16xf32>
    %23 = vector.extract_strided_slice %18 {offsets = [0, 0], sizes = [16, 16], strides = [1, 1]} : vector<16x64xf32> to vector<16x16xf32>
    %24 = vector.extract_strided_slice %19 {offsets = [0, 0], sizes = [16, 16], strides = [1, 1]} : vector<16x64xf32> to vector<16x16xf32>
    %cst_12 = arith.constant dense<0.000000e+00> : vector<16x16xf32>
    %25 = tpu.matmul %22, %23, %cst_12 {dimension_numbers = #tpu.dot_dimension_numbers<[1], [1], [0], [0], [0, 0, 1, 0], [], []>} : vector<16x16xf32>, vector<16x16xf32>, vector<16x16xf32> -> vector<16x16xf32>
    %c0_13 = arith.constant 0 : index
    %c0_14 = arith.constant 0 : index
    %c0_15 = arith.constant 0 : index
    %26 = vector.load %arg5[%c0_13, %c0_14, %c0_15] : memref<4x16x16xf32, #tpu.memory_space<vmem>>, vector<1x16x16xf32>
    %27 = vector.shape_cast %26 : vector<1x16x16xf32> to vector<16x16xf32>
    %28 = arith.addf %27, %21 : vector<16x16xf32>
    %29 = arith.addf %25, %28 : vector<16x16xf32>
    %cst_16 = arith.constant dense<0xFF800000> : vector<16xf32>
    %30 = vector.multi_reduction <maximumf>, %29, %cst_16 [1] : vector<16x16xf32> to vector<16xf32>
    %31 = vector.shape_cast %30 : vector<16xf32> to vector<16x1xf32>
    %32 = vector.broadcast %31 : vector<16x1xf32> to vector<16x16xf32>
    %33 = arith.subf %29, %32 : vector<16x16xf32>
    %34 = math.exp %33 : vector<16x16xf32>
    %cst_17 = arith.constant dense<0.000000e+00> : vector<16xf32>
    %35 = vector.multi_reduction <add>, %34, %cst_17 [1] : vector<16x16xf32> to vector<16xf32>
    %36 = vector.shape_cast %35 : vector<16xf32> to vector<16x1xf32>
    %37 = tpu.reciprocal %36 {approx = true} : vector<16x1xf32> -> vector<16x1xf32>
    %38 = vector.broadcast %37 : vector<16x1xf32> to vector<16x16xf32>
    %39 = arith.mulf %34, %38 : vector<16x16xf32>
    %cst_18 = arith.constant dense<0.000000e+00> : vector<16x16xf32>
    %40 = tpu.matmul %39, %24, %cst_18 {dimension_numbers = #tpu.dot_dimension_numbers<[1], [0], [0], [1], [0, 0, 1, 1], [], []>} : vector<16x16xf32>, vector<16x16xf32>, vector<16x16xf32> -> vector<16x16xf32>
    %41 = vector.extract_strided_slice %17 {offsets = [0, 16], sizes = [16, 16], strides = [1, 1]} : vector<16x64xf32> to vector<16x16xf32>
    %42 = vector.extract_strided_slice %18 {offsets = [0, 16], sizes = [16, 16], strides = [1, 1]} : vector<16x64xf32> to vector<16x16xf32>
    %43 = vector.extract_strided_slice %19 {offsets = [0, 16], sizes = [16, 16], strides = [1, 1]} : vector<16x64xf32> to vector<16x16xf32>
    %cst_19 = arith.constant dense<0.000000e+00> : vector<16x16xf32>
    %44 = tpu.matmul %41, %42, %cst_19 {dimension_numbers = #tpu.dot_dimension_numbers<[1], [1], [0], [0], [0, 0, 1, 0], [], []>} : vector<16x16xf32>, vector<16x16xf32>, vector<16x16xf32> -> vector<16x16xf32>
    %c1 = arith.constant 1 : index
    %c0_20 = arith.constant 0 : index
    %c0_21 = arith.constant 0 : index
    %45 = vector.load %arg5[%c1, %c0_20, %c0_21] : memref<4x16x16xf32, #tpu.memory_space<vmem>>, vector<1x16x16xf32>
    %46 = vector.shape_cast %45 : vector<1x16x16xf32> to vector<16x16xf32>
    %47 = arith.addf %46, %21 : vector<16x16xf32>
    %48 = arith.addf %44, %47 : vector<16x16xf32>
    %cst_22 = arith.constant dense<0xFF800000> : vector<16xf32>
    %49 = vector.multi_reduction <maximumf>, %48, %cst_22 [1] : vector<16x16xf32> to vector<16xf32>
    %50 = vector.shape_cast %49 : vector<16xf32> to vector<16x1xf32>
    %51 = vector.broadcast %50 : vector<16x1xf32> to vector<16x16xf32>
    %52 = arith.subf %48, %51 : vector<16x16xf32>
    %53 = math.exp %52 : vector<16x16xf32>
    %cst_23 = arith.constant dense<0.000000e+00> : vector<16xf32>
    %54 = vector.multi_reduction <add>, %53, %cst_23 [1] : vector<16x16xf32> to vector<16xf32>
    %55 = vector.shape_cast %54 : vector<16xf32> to vector<16x1xf32>
    %56 = tpu.reciprocal %55 {approx = true} : vector<16x1xf32> -> vector<16x1xf32>
    %57 = vector.broadcast %56 : vector<16x1xf32> to vector<16x16xf32>
    %58 = arith.mulf %53, %57 : vector<16x16xf32>
    %cst_24 = arith.constant dense<0.000000e+00> : vector<16x16xf32>
    %59 = tpu.matmul %58, %43, %cst_24 {dimension_numbers = #tpu.dot_dimension_numbers<[1], [0], [0], [1], [0, 0, 1, 1], [], []>} : vector<16x16xf32>, vector<16x16xf32>, vector<16x16xf32> -> vector<16x16xf32>
    %60 = vector.extract_strided_slice %17 {offsets = [0, 32], sizes = [16, 16], strides = [1, 1]} : vector<16x64xf32> to vector<16x16xf32>
    %61 = vector.extract_strided_slice %18 {offsets = [0, 32], sizes = [16, 16], strides = [1, 1]} : vector<16x64xf32> to vector<16x16xf32>
    %62 = vector.extract_strided_slice %19 {offsets = [0, 32], sizes = [16, 16], strides = [1, 1]} : vector<16x64xf32> to vector<16x16xf32>
    %cst_25 = arith.constant dense<0.000000e+00> : vector<16x16xf32>
    %63 = tpu.matmul %60, %61, %cst_25 {dimension_numbers = #tpu.dot_dimension_numbers<[1], [1], [0], [0], [0, 0, 1, 0], [], []>} : vector<16x16xf32>, vector<16x16xf32>, vector<16x16xf32> -> vector<16x16xf32>
    %c2 = arith.constant 2 : index
    %c0_26 = arith.constant 0 : index
    %c0_27 = arith.constant 0 : index
    %64 = vector.load %arg5[%c2, %c0_26, %c0_27] : memref<4x16x16xf32, #tpu.memory_space<vmem>>, vector<1x16x16xf32>
    %65 = vector.shape_cast %64 : vector<1x16x16xf32> to vector<16x16xf32>
    %66 = arith.addf %65, %21 : vector<16x16xf32>
    %67 = arith.addf %63, %66 : vector<16x16xf32>
    %cst_28 = arith.constant dense<0xFF800000> : vector<16xf32>
    %68 = vector.multi_reduction <maximumf>, %67, %cst_28 [1] : vector<16x16xf32> to vector<16xf32>
    %69 = vector.shape_cast %68 : vector<16xf32> to vector<16x1xf32>
    %70 = vector.broadcast %69 : vector<16x1xf32> to vector<16x16xf32>
    %71 = arith.subf %67, %70 : vector<16x16xf32>
    %72 = math.exp %71 : vector<16x16xf32>
    %cst_29 = arith.constant dense<0.000000e+00> : vector<16xf32>
    %73 = vector.multi_reduction <add>, %72, %cst_29 [1] : vector<16x16xf32> to vector<16xf32>
    %74 = vector.shape_cast %73 : vector<16xf32> to vector<16x1xf32>
    %75 = tpu.reciprocal %74 {approx = true} : vector<16x1xf32> -> vector<16x1xf32>
    %76 = vector.broadcast %75 : vector<16x1xf32> to vector<16x16xf32>
    %77 = arith.mulf %72, %76 : vector<16x16xf32>
    %cst_30 = arith.constant dense<0.000000e+00> : vector<16x16xf32>
    %78 = tpu.matmul %77, %62, %cst_30 {dimension_numbers = #tpu.dot_dimension_numbers<[1], [0], [0], [1], [0, 0, 1, 1], [], []>} : vector<16x16xf32>, vector<16x16xf32>, vector<16x16xf32> -> vector<16x16xf32>
    %79 = vector.extract_strided_slice %17 {offsets = [0, 48], sizes = [16, 16], strides = [1, 1]} : vector<16x64xf32> to vector<16x16xf32>
    %80 = vector.extract_strided_slice %18 {offsets = [0, 48], sizes = [16, 16], strides = [1, 1]} : vector<16x64xf32> to vector<16x16xf32>
    %81 = vector.extract_strided_slice %19 {offsets = [0, 48], sizes = [16, 16], strides = [1, 1]} : vector<16x64xf32> to vector<16x16xf32>
    %cst_31 = arith.constant dense<0.000000e+00> : vector<16x16xf32>
    %82 = tpu.matmul %79, %80, %cst_31 {dimension_numbers = #tpu.dot_dimension_numbers<[1], [1], [0], [0], [0, 0, 1, 0], [], []>} : vector<16x16xf32>, vector<16x16xf32>, vector<16x16xf32> -> vector<16x16xf32>
    %c3 = arith.constant 3 : index
    %c0_32 = arith.constant 0 : index
    %c0_33 = arith.constant 0 : index
    %83 = vector.load %arg5[%c3, %c0_32, %c0_33] : memref<4x16x16xf32, #tpu.memory_space<vmem>>, vector<1x16x16xf32>
    %84 = vector.shape_cast %83 : vector<1x16x16xf32> to vector<16x16xf32>
    %85 = arith.addf %84, %21 : vector<16x16xf32>
    %86 = arith.addf %82, %85 : vector<16x16xf32>
    %cst_34 = arith.constant dense<0xFF800000> : vector<16xf32>
    %87 = vector.multi_reduction <maximumf>, %86, %cst_34 [1] : vector<16x16xf32> to vector<16xf32>
    %88 = vector.shape_cast %87 : vector<16xf32> to vector<16x1xf32>
    %89 = vector.broadcast %88 : vector<16x1xf32> to vector<16x16xf32>
    %90 = arith.subf %86, %89 : vector<16x16xf32>
    %91 = math.exp %90 : vector<16x16xf32>
    %cst_35 = arith.constant dense<0.000000e+00> : vector<16xf32>
    %92 = vector.multi_reduction <add>, %91, %cst_35 [1] : vector<16x16xf32> to vector<16xf32>
    %93 = vector.shape_cast %92 : vector<16xf32> to vector<16x1xf32>
    %94 = tpu.reciprocal %93 {approx = true} : vector<16x1xf32> -> vector<16x1xf32>
    %95 = vector.broadcast %94 : vector<16x1xf32> to vector<16x16xf32>
    %96 = arith.mulf %91, %95 : vector<16x16xf32>
    %cst_36 = arith.constant dense<0.000000e+00> : vector<16x16xf32>
    %97 = tpu.matmul %96, %81, %cst_36 {dimension_numbers = #tpu.dot_dimension_numbers<[1], [0], [0], [1], [0, 0, 1, 1], [], []>} : vector<16x16xf32>, vector<16x16xf32>, vector<16x16xf32> -> vector<16x16xf32>
    %98 = tpu.concatenate %40, %59, %78, %97 in 1 : vector<16x16xf32>, vector<16x16xf32>, vector<16x16xf32>, vector<16x16xf32> -> vector<16x64xf32>
    %c0_37 = arith.constant 0 : index
    %c0_38 = arith.constant 0 : index
    %99 = vector.load %arg4[%c0_37, %c0_38] : memref<64x64xf32, #tpu.memory_space<vmem>>, vector<64x64xf32>
    %cst_39 = arith.constant dense<0.000000e+00> : vector<16x64xf32>
    %100 = tpu.matmul %98, %99, %cst_39 {dimension_numbers = #tpu.dot_dimension_numbers<[1], [0], [0], [1], [0, 0, 1, 1], [], []>} : vector<16x64xf32>, vector<64x64xf32>, vector<16x64xf32> -> vector<16x64xf32>
    %101 = arith.addf %1, %100 : vector<16x64xf32>
    %c0_40 = arith.constant 0 : index
    %c0_41 = arith.constant 0 : index
    %c0_42 = arith.constant 0 : index
    %102 = vector.load %arg7[%c0_40, %c0_41, %c0_42] : memref<1x16x64xf32, #tpu.memory_space<vmem>>, vector<1x16x64xf32>
    %103 = vector.shape_cast %102 : vector<1x16x64xf32> to vector<16x64xf32>
    %104 = vector.shape_cast %101 : vector<16x64xf32> to vector<1x16x64xf32>
    tpu.vector_store %arg7[%c0_40, %c0_41, %c0_42], %104 {strides = array<i32>} : memref<1x16x64xf32, #tpu.memory_space<vmem>>, vector<1x16x64xf32>,
    return
  }
  func.func @transform_0(%arg0: i32) -> (i32, i32, i32) {
    %c0_i32 = arith.constant 0 : i32
    %c0_i32_0 = arith.constant 0 : i32
    %c0_i32_1 = arith.constant 0 : i32
    return %arg0, %c0_i32, %c0_i32_0 : i32, i32, i32
  }
  func.func @transform_1(%arg0: i32) -> (i32, i32) {
    %c0_i32 = arith.constant 0 : i32
    %c0_i32_0 = arith.constant 0 : i32
    %c0_i32_1 = arith.constant 0 : i32
    return %c0_i32, %c0_i32_0 : i32, i32
  }
  func.func @transform_2(%arg0: i32) -> (i32, i32) {
    %c0_i32 = arith.constant 0 : i32
    %c0_i32_0 = arith.constant 0 : i32
    %c0_i32_1 = arith.constant 0 : i32
    return %c0_i32, %c0_i32_0 : i32, i32
  }
  func.func @transform_3(%arg0: i32) -> (i32, i32) {
    %c0_i32 = arith.constant 0 : i32
    %c0_i32_0 = arith.constant 0 : i32
    %c0_i32_1 = arith.constant 0 : i32
    return %c0_i32, %c0_i32_0 : i32, i32
  }
  func.func @transform_4(%arg0: i32) -> (i32, i32, i32) {
    %c0_i32 = arith.constant 0 : i32
    %c0_i32_0 = arith.constant 0 : i32
    %c0_i32_1 = arith.constant 0 : i32
    %c0_i32_2 = arith.constant 0 : i32
    return %c0_i32, %c0_i32_0, %c0_i32_1 : i32, i32, i32
  }
  func.func @transform_5(%arg0: i32) -> (i32, i32, i32) {
    %c0_i32 = arith.constant 0 : i32
    %c0_i32_0 = arith.constant 0 : i32
    %c0_i32_1 = arith.constant 0 : i32
    return %arg0, %c0_i32, %c0_i32_0 : i32, i32, i32
  }
  func.func @transform_6(%arg0: i32) -> (i32, i32, i32) {
    %c0_i32 = arith.constant 0 : i32
    %c0_i32_0 = arith.constant 0 : i32
    %c0_i32_1 = arith.constant 0 : i32
    return %arg0, %c0_i32, %c0_i32_0 : i32, i32, i32
  }
}

</mosaic_0001>

<bundles_post_ra>
// kernel: tpu_custom_call.1
= control target key start
LH: loop header
LB: loop body
LE: loop exit
PB: predicated region body
PF: predicated region fallthrough
CT: control target
= control target key end

     0   :  { %s2697_s0 = inlined_call_operand.hbm [shape: f32[2,16,64], index: 0, kind: input, shape index: {}]   ;;  %s2698_s1 = inlined_call_operand.vmem [shape: f32[1,64], index: 1, kind: input, shape index: {}]   ;;  %s2699_s2 = inlined_call_operand.hbm [shape: f32[64,192], index: 2, kind: input, shape index: {}]   ;;  %s2700_s3 = inlined_call_operand.hbm [shape: f32[64,64], index: 3, kind: input, shape index: {}]   ;;  %s2701_s4 = inlined_call_operand.hbm [shape: f32[4,16,16], index: 4, kind: input, shape index: {}]   ;;  %s2702_s5 = inlined_call_operand.hbm [shape: f32[2,16,16], index: 5, kind: input, shape index: {}]   ;;  %s2703_s6 = inlined_call_operand.hbm [shape: f32[2,16,64], index: 6, kind: output, shape index: {}]  }
   0x1   :  { %2718 = sst [smem:[#allocation22_spill]] %s2697_s0 }
   0x2   :  { %2719 = sst [smem:[#allocation23_spill]] %s2699_s2 }
   0x3   :  { %11 = vsyncpa [#allocation3], 0 }
   0x4   :  { %13 = vsyncpa [#allocation3 + $0x1], 0 }
   0x5   :  { %14 = vsyncpa [#allocation6], 0 }
   0x6   :  { %15 = vsyncpa [#allocation9], 0 }
   0x7   :  { %16 = vsyncpa [#allocation4], 0 }
   0x8   :  { %18 = vsyncpa [#allocation4 + $0x1], 0  ;;  %s2247_s21 = smov 0   ;;  %s2249_s22 = smov 0  }
   0x9   :  { %s2251_s23 = smov 0   ;;  %s2253_s24 = smov 0  }
   0xa LB: > { %2720 = sst [smem:[#allocation17_spill]] %s2186_s23  ;;  %s2268_s25 = sadd.s32 4294967295, %s2190_s24   ;;  %s2190_s24 = sphi %s2253_s24, %s2752_s24   ;;  %s2186_s23 = sphi %s2251_s23, %s2754_s23   ;;  %s2182_s22 = sphi %s2249_s22, %s2756_s22   ;;  %s2178_s21 = sphi %s2247_s21, %s2755_s21  }
   0xb   : > { %2721 = sst [smem:[#allocation18_spill]] %s2190_s24  ;;  %s1556_s26 = sadd.s32 4294967294, %s2190_s24  }
   0xc   : > { %p44_p0 = scmp.ne.s32.totalorder %s2182_s22, %s2178_s21  ;;  %p2704_p1 = scmp.eq.s32.totalorder %s2268_s25, 0 }
   0xd   : > { %p184_p3 = scmp.eq.s32.totalorder %s1556_s26, 1  ;;  %p1557_p5 = scmp.ge.s32.totalorder %s2190_s24, 1 }
   0xe   : > { %p2277_p4 = por %p2704_p1, %p44_p0  ;;  %p191_p7 = scmp.lt.s32.totalorder %s2190_s24, 3 }
   0xf   : > { %p2282_p6 = por %p184_p3, %p44_p0  ;;  %s2192_s30 = smov [#allocation5]  }
  0x10   : > { %s2722_s27 = scalar_select %p2277_p4, 1, 0 }
  0x11   : > { %s2723_s28 = scalar_select %p2282_p6, 1, 0 }
  0x12   : > { %p2287_p8 = pnand %p1557_p5, %p191_p7  ;;  %s206_s7 = sshll.u32 %s2192_s30, 4  ;;  %s2291_s7 = int_to_ptr.vmem [resolvable:$true] %s206_s7 }
  0x13   : > { %2724 = sst [smem:[#allocation19_spill]] %s2723_s28  ;;  %s2303_s9 = sadd.s32 1, %s2190_s24  }
  0x14   : > { %s2725_s29 = scalar_select %p2287_p8, 1, 0 }
  0x15   : > { %p1819_p9 = pneg %p2287_p8  ;;  %2727 = sst [smem:[#allocation20_spill]] %s2303_s9 }
  0x16   : > { %s31_s10 = sadd.s32 1, %s2186_s23  ;;  %s28_s11 = ssub.s32 %s2190_s24, %s2303_s9 }
  0x17   : > { %p2298_p11 = pnand %p1819_p9, %p2704_p1  ;;  %s2728_s2 = sld [smem:[#allocation23_spill]] }
  0x19   : > { %s2726_s8 = scalar_select %p2298_p11, 1, 0 }
  0x1a   : > { %p2316_p13 = pneg %p2298_p11 }
  0x1d   : > { %s1968_s14 = scalar_lea.hbm %s2728_s2, 2048 }
  0x1e   : > { %p1969_p12 = scmp.ne.s32.totalorder %s2728_s2, %s1968_s14  ;;  %p1975_p5 = scmp.lt.u32.totalorder %s1968_s14, %s2728_s2 }
  0x20   : > { %p1971_p0 = pnand %p2316_p13, %p1969_p12 }
  0x22   : > { %p1972_p3 = pneg %p1971_p0 }
  0x24   : > { %p1977_p7 = pnand %p1975_p5, %p1972_p3 }
  0x26   : > { %1980 = shalt.err (!%p1977_p7)
}
  0x27   : > { %s1981_s20 = scalar_lea.vmem %s2291_s7, 2048  ;;  %p1989_p2 = scmp.lt.s32.totalorder %s2291_s7, %s2291_s7 }
  0x28   : > { %p1982_p9 = scmp.ne.s32.totalorder %s2291_s7, %s1981_s20  ;;  %p1990_p6 = scmp.lt.s32.totalorder %s1981_s20, %s1981_s20 }
  0x2a   : > { %p1984_p10 = pnand %p1982_p9, %p2316_p13  ;;  %p1991_p12 = por %p1990_p6, %p1989_p2 }
  0x2c   : > { %p1985_p1 = pneg %p1984_p10 }
  0x2e   : > { %p1992_p0 = pnand %p1991_p12, %p1985_p1 }
  0x30   : > { %1995 = shalt.err (!%p1992_p0)
}
  0x31   : > { %s2193_s26 = smov 256   ;;  %s2194_s30 = smov 16  }
  0x32   : > { %1822 = dma.hbm_to_vmem [thread:$0]  (!%p2298_p11), %s2728_s2, 2048, %s2291_s7, [#allocation6], %s2193_s26, %s2193_s26, %s2194_s30  }
  0x33   : > { %p29_p1 = scmp.eq.s32.totalorder %s28_s11, 0  ;;  %p38_p2 = scmp.ne.s32.totalorder %s2186_s23, %s2182_s22 }
  0x34   : > { %p39_p6 = scmp.eq.s32.totalorder %s2190_s24, 0  ;;  %p2731_p3 = scmp.eq.s32.totalorder %s2268_s25, 1 }
  0x35   : > { %s2341_s14 = scalar_select %p29_p1, %s2186_s23, %s31_s10  }
  0x36   : > { %p40_p10 = por %p39_p6, %p38_p2  ;;  %p2345_p5 = por %p2731_p3, %p38_p2 }
  0x37   : > { %2730 = sst [smem:[#allocation21_spill]] %s2341_s14  ;;  %p1843_p7 = scmp.lt.s32.totalorder %s2190_s24, 2 }
  0x38   : > { %s2732_s15 = scalar_select %p2345_p5, 1, 0 }
  0x39   : > { %s246_s16 = sand.u32 1, %s2190_s24   ;;  %s248_s18 = sand.u32 1, %s2186_s23  }
  0x3a   : > { %s1562_s19 = sshll.u32 %s248_s18, 4  ;;  %s1609_s20 = sshll.u32 %s2190_s24, 8 }
  0x3b   : > { %s2733_s0 = sld [smem:[#allocation22_spill]]  ;;  %s250_s10 = scalar_lea.vmem [#allocation2], %s1562_s19 }
  0x3c   : > { %s257_s11 = sshll.u32 %s250_s10, 4  ;;  %p2360_p9 = pnand %p1843_p7, %p40_p10  ;;  %s2358_s11 = int_to_ptr.vmem [resolvable:$true] %s257_s11 }
  0x3d   : > { %s2367_s28 = scalar_lea.hbm %s2702_s5, %s1609_s20  ;;  %s271_s9 = scalar_lea.vmem [#allocation10], %s1562_s19 }
  0x3e   : > { %s2734_s26 = scalar_select %p2360_p9, 1, 0 }
  0x3f   : > { %s2369_s13 = sshll.u32 %s271_s9, 4  ;;  %s2371_s18 = scalar_lea.sflag [#allocation3], %s246_s16  ;;  %s2403_s13 = int_to_ptr.vmem [resolvable:$true] %s2369_s13 }
  0x40   : > { %p2715_p0 = pneg %p2360_p9 }
  0x41   : > { %s2356_s7 = scalar_lea.hbm %s2733_s0, %s1609_s20  ;;  %s2001_s30 = scalar_lea.hbm %s2733_s0, 512 }
  0x42   : > { %s1996_s10 = scalar_lea.hbm %s2356_s7, 256  ;;  %p2002_p6 = scmp.lt.u32.totalorder %s2356_s7, %s2733_s0 }
  0x43   : > { %p1997_p12 = scmp.ne.s32.totalorder %s2356_s7, %s1996_s10  ;;  %p2003_p10 = scmp.lt.u32.totalorder %s2001_s30, %s1996_s10 }
  0x44   : > { %p2005_p7 = scmp.lt.u32.totalorder %s1996_s10, %s2356_s7 }
  0x45   : > { %p1999_p1 = pnand %p2715_p0, %p1997_p12  ;;  %p2004_p3 = por %p2003_p10, %p2002_p6 }
  0x47   : > { %p2000_p2 = pneg %p1999_p1  ;;  %p2006_p5 = por %p2005_p7, %p2004_p3 }
  0x49   : > { %p2007_p4 = pnand %p2006_p5, %p2000_p2 }
  0x4b   : > { %2010 = shalt.err (!%p2007_p4)
}
  0x4c   : > { %s2011_s16 = scalar_lea.vmem %s2358_s11, 256  ;;  %s2195_s2 = smov [#allocation2]  }
  0x4d   : > { %p2012_p12 = scmp.ne.s32.totalorder %s2358_s11, %s2011_s16  ;;  %s2016_s14 = sshll.u32 %s2195_s2, 4  ;;  %s2017_s14 = int_to_ptr.vmem [resolvable:$false] %s2016_s14 }
  0x4e   : > { %s2018_s19 = scalar_lea.vmem %s2017_s14, 512  ;;  %p2019_p11 = scmp.lt.s32.totalorder %s2358_s11, %s2017_s14 }
  0x4f   : > { %p2014_p1 = pnand %p2012_p12, %p2715_p0  ;;  %p2020_p6 = scmp.lt.s32.totalorder %s2018_s19, %s2011_s16 }
  0x51   : > { %p2015_p8 = pneg %p2014_p1  ;;  %p2021_p10 = por %p2020_p6, %p2019_p11 }
  0x53   : > { %p2022_p3 = pnand %p2021_p10, %p2015_p8 }
  0x55   : > { %2025 = shalt.err (!%p2022_p3)
}
  0x56   : > { %s2196_s9 = smov 128   ;;  %s2197_s10 = smov 8  }
  0x57   : > { %1832 = dma.hbm_to_vmem [thread:$0]  (!%p2360_p9), %s2356_s7, 256, %s2358_s11, %s2371_s18, %s2196_s9, %s2196_s9, %s2197_s10  }
  0x58   : > { %s2198_s30 = smov [#allocation7]   ;;  %s2199_s20 = smov [#allocation8]  }
  0x59   : > { %s219_s12 = sshll.u32 %s2198_s30, 4  ;;  %s232_s16 = sshll.u32 %s2199_s20, 4  ;;  %s220_s12 = int_to_ptr.vmem [resolvable:$true] %s219_s12  ;;  %s233_s16 = int_to_ptr.vmem [resolvable:$true] %s232_s16 }
  0x5a   : > { %s2026_s19 = scalar_lea.hbm %s2700_s3, 1024 }
  0x5b   : > { %p2027_p4 = scmp.ne.s32.totalorder %s2700_s3, %s2026_s19  ;;  %p2033_p5 = scmp.lt.u32.totalorder %s2026_s19, %s2700_s3 }
  0x5d   : > { %p2029_p8 = pnand %p2027_p4, %p2316_p13 }
  0x5f   : > { %p2030_p11 = pneg %p2029_p8 }
  0x61   : > { %p2035_p2 = pnand %p2033_p5, %p2030_p11 }
  0x63   : > { %2038 = shalt.err (!%p2035_p2)
}
  0x64   : > { %s2039_s11 = scalar_lea.vmem %s220_s12, 1024  ;;  %p2047_p6 = scmp.lt.s32.totalorder %s220_s12, %s220_s12 }
  0x65   : > { %p2040_p7 = scmp.ne.s32.totalorder %s220_s12, %s2039_s11  ;;  %p2048_p10 = scmp.lt.s32.totalorder %s2039_s11, %s2039_s11 }
  0x67   : > { %p2042_p12 = pnand %p2040_p7, %p2316_p13  ;;  %p2049_p3 = por %p2048_p10, %p2047_p6 }
  0x69   : > { %p2043_p1 = pneg %p2042_p12 }
  0x6b   : > { %p2050_p0 = pnand %p2049_p3, %p2043_p1 }
  0x6d   : > { %2053 = shalt.err (!%p2050_p0)
}
  0x6e   : > { %p2735_p4 = scmp.ne.s32.totalorder %s2726_s8, 0  ;;  %s2054_s20 = scalar_lea.hbm %s2701_s4, 1024 }
  0x6f   : > { %p2055_p8 = scmp.ne.s32.totalorder %s2701_s4, %s2054_s20  ;;  %p2061_p5 = scmp.lt.u32.totalorder %s2054_s20, %s2701_s4 }
  0x70   : > { %1825 = dma.hbm_to_vmem [thread:$0]  (!%p2735_p4), %s2700_s3, 1024, %s220_s12, [#allocation6], %s2196_s9, %s2196_s9, %s2197_s10  }
  0x71   : > { %p2057_p0 = pnand %p2055_p8, %p2316_p13 }
  0x73   : > { %p2058_p11 = pneg %p2057_p0 }
  0x75   : > { %p2063_p2 = pnand %p2061_p5, %p2058_p11 }
  0x77   : > { %2066 = shalt.err (!%p2063_p2)
}
  0x78   : > { %s2067_s11 = scalar_lea.vmem %s233_s16, 1024  ;;  %p2075_p6 = scmp.lt.s32.totalorder %s233_s16, %s233_s16 }
  0x79   : > { %p2068_p7 = scmp.ne.s32.totalorder %s233_s16, %s2067_s11  ;;  %p2076_p10 = scmp.lt.s32.totalorder %s2067_s11, %s2067_s11 }
  0x7b   : > { %p2070_p12 = pnand %p2068_p7, %p2316_p13  ;;  %p2077_p3 = por %p2076_p10, %p2075_p6 }
  0x7d   : > { %p2071_p1 = pneg %p2070_p12 }
  0x7f   : > { %p2078_p9 = pnand %p2077_p3, %p2071_p1 }
  0x81   : > { %2081 = shalt.err (!%p2078_p9)
}
  0x82   : > { %1828 = dma.hbm_to_vmem [thread:$0]  (!%p2735_p4), %s2701_s4, 1024, %s233_s16, [#allocation9], %s2196_s9, %s2196_s9, %s2197_s10  }
  0x83   : > { %s2082_s17 = scalar_lea.hbm %s2367_s28, 256  ;;  %p2736_p8 = scmp.ne.s32.totalorder %s2734_s26, 0 }
  0x84   : > { %p2083_p13 = scmp.ne.s32.totalorder %s2367_s28, %s2082_s17  ;;  %s2087_s24 = scalar_lea.hbm %s2702_s5, 512 }
  0x85   : > { %p2737_p0 = pneg %p2736_p8  ;;  %p2088_p5 = scmp.lt.u32.totalorder %s2367_s28, %s2702_s5 }
  0x86   : > { %p2089_p2 = scmp.lt.u32.totalorder %s2087_s24, %s2082_s17  ;;  %p2091_p12 = scmp.lt.u32.totalorder %s2082_s17, %s2367_s28 }
  0x87   : > { %p2085_p11 = pnand %p2083_p13, %p2737_p0 }
  0x88   : > { %p2090_p7 = por %p2089_p2, %p2088_p5 }
  0x89   : > { %p2086_p9 = pneg %p2085_p11 }
  0x8a   : > { %p2092_p1 = por %p2091_p12, %p2090_p7 }
  0x8c   : > { %p2093_p6 = pnand %p2092_p1, %p2086_p9 }
  0x8e   : > { %2096 = shalt.err (!%p2093_p6)
}
  0x8f   : > { %s2097_s16 = scalar_lea.vmem %s2403_s13, 256  ;;  %p2738_p10 = pmov %p2737_p0 }
  0x90   : > { %p2098_p4 = scmp.ne.s32.totalorder %s2403_s13, %s2097_s16  ;;  %s2200_s2 = smov [#allocation10]  }
  0x91   : > { %s2102_s14 = sshll.u32 %s2200_s2, 4  ;;  %s2103_s14 = int_to_ptr.vmem [resolvable:$false] %s2102_s14 }
  0x92   : > { %p2100_p3 = pnand %p2098_p4, %p2738_p10  ;;  %s2104_s19 = scalar_lea.vmem %s2103_s14, 512 }
  0x93   : > { %p2105_p0 = scmp.lt.s32.totalorder %s2403_s13, %s2103_s14  ;;  %p2106_p11 = scmp.lt.s32.totalorder %s2104_s19, %s2097_s16 }
  0x94   : > { %p2101_p13 = pneg %p2100_p3 }
  0x95   : > { %p2107_p5 = por %p2106_p11, %p2105_p0 }
  0x97   : > { %p2108_p2 = pnand %p2107_p5, %p2101_p13 }
  0x99   : > { %2111 = shalt.err (!%p2108_p2)
}
  0x9a   : > { %1835 = dma.hbm_to_vmem [thread:$0]  (!%p2736_p8), %s2367_s28, 256, %s2403_s13, %s2371_s18, %s2196_s9, %s2196_s9, %s2197_s10  }
  0x9b   : > { %p2739_p9 = scmp.ne.s32.totalorder %s2725_s29, 0 }
  0x9c   : > { %s292_s7 = sand.u32 (!%p2739_p9), 1, %s2268_s25   ;;  %s294_s11 = sand.u32 (!%p2739_p9), 1, %s2182_s22  }
  0x9d   : > { %290 = sbr.rel (%p2739_p9) target bundleno = 2913 (0xb61), region = 44  ;;  %s2480_s12 = sshll.u32 (!%p2739_p9), %s294_s11, 4 }
  0x9e   : > { %s293_s26 = scalar_lea.sflag (!%p2739_p9), [#allocation3], %s292_s7  ;;  %s296_s0 = scalar_lea.vmem (!%p2739_p9), [#allocation2], %s2480_s12 }
  0x9f   : > { %p2740_p7 = scmp.ne.s32.totalorder (!%p2739_p9), %s2722_s27, 0 }
  0xa4   : > { %2157 = dma.done.wait (%p2740_p7), %s293_s26, 256  }
  0xa5   : > { %2159 = vsyncadd (%p2740_p7), %s293_s26, 4294967040  ;;  %p2741_p8 = scmp.eq.s32.totalorder %s2268_s25, 0 }
  0xa7   : > { %2161 = dma.done.wait (%p2741_p8), [#allocation6], 3072   ;;  %p2742_p12 = pmov %p2741_p8 }
  0xa8   : > { %p2743_p1 = pmov %p2741_p8 }
  0xa9   : > { %2163 = vsyncadd (%p2742_p12), [#allocation6], 4294964224 }
  0xaa   : > { %2165 = dma.done.wait (%p2743_p1), [#allocation9], 1024   ;;  %p2744_p6 = pmov %p2743_p1 }
  0xab   : > { %s317_s29 = scalar_lea.vmem [#allocation10], %s2480_s12 }
  0xac   : > { %2167 = vsyncadd (%p2744_p6), [#allocation9], 4294966272 }
  0xad   : > { %2169 = dma.done.wait (%p2740_p7), %s293_s26, 256  }
  0xae   : > { %2171 = vsyncadd (%p2740_p7), %s293_s26, 4294967040  ;;  %v2500_v0 = vld [vmem:[%s296_s0] sm:$0xff]  ;;  %vm356_vm0 = vcmask 523264   ;;  %v2502_v1 = vld [vmem:[%s296_s0 + $0x8] sm:$0xff]  ;;  %v2201_v25 = vmov 0.0   ;;  %vm491_vm1 = vcmask 130048  }
  0xaf   : > { %v354_v2 = vmul.f32 %v2500_v0, %v2500_v0  ;;  %v355_v3 = vmul.f32 %v2502_v1, %v2502_v1  ;;  %v381_v6 = vld [vmem:[#allocation5 + $0x8] sm:$0xff]  ;;  %v383_v7 = vld [vmem:[#allocation5 + $0x18] sm:$0xff]  ;;  %v380_v9 = vld [vmem:[#allocation5] sm:$0xff]  ;;  %466 = vmatprep.mubr.f32.mxu0 %v2201_v25  ;;  %s2202_s13 = smov 64   ;;  %s2203_s18 = smov 112   ;;  %vm1321_vm3 = vcmask 261120  }
  0xb0   : > { %v1729_v8 = vpack.c.bf16 %v383_v7, %v381_v6  ;;  %v382_v10 = vld [vmem:[#allocation5 + $0x10] sm:$0xff]  ;;  %v385_v12 = vld [vmem:[#allocation5 + $0x28] sm:$0xff]  ;;  %v387_v13 = vld [vmem:[#allocation5 + $0x38] sm:$0xff]  ;;  %s2204_s9 = smov 48   ;;  %s2205_s10 = smov 32   ;;  %vm1324_vm4 = vcmask 392192  }
  0xb1   : > { %v357_v4 = vsel %vm356_vm0, %v354_v2, 0.0  ;;  %v360_v5 = vsel %vm356_vm0, %v355_v3, 0.0  ;;  %v1731_v11 = vpack.c.bf16 %v382_v10, %v380_v9  ;;  %v1733_v14 = vpack.c.bf16 %v387_v13, %v385_v12  ;;  %v384_v15 = vld [vmem:[#allocation5 + $0x20] sm:$0xff]  ;;  %v386_v16 = vld [vmem:[#allocation5 + $0x30] sm:$0xff]  ;;  %v389_v18 = vld [vmem:[#allocation5 + $0x48] sm:$0xff]  ;;  %s2206_s17 = smov 96  }
  0xb2   : > { %358 = vadd.xlane.f32.xlu0 %v357_v4  ;;  %1730 = vmatprep.subr.bf16.mxu0 %v1729_v8  ;;  %v1735_v17 = vpack.c.bf16 %v386_v16, %v384_v15  ;;  %v391_v19 = vld [vmem:[#allocation5 + $0x58] sm:$0xff]  ;;  %v388_v20 = vld [vmem:[#allocation5 + $0x40] sm:$0xff]  ;;  %v390_v22 = vld [vmem:[#allocation5 + $0x50] sm:$0xff]  ;;  %s2207_s23 = smov 16   ;;  %s2208_s8 = smov 80  }
  0xb3   : > { %1732 = vmatpush1.bf16.msra.mxu0 %v1731_v11  ;;  %v1737_v21 = vpack.c.bf16 %v391_v19, %v389_v18  ;;  %v393_v23 = vld [vmem:[#allocation5 + $0x68] sm:$0xff]  ;;  %v395_v24 = vld [vmem:[#allocation5 + $0x78] sm:$0xff]  ;;  %v1739_v26 = vpack.c.bf16 %v390_v22, %v388_v20  ;;  %v392_v28 = vld [vmem:[#allocation5 + $0x60] sm:$0xff]  ;;  %s350_s24 = scalar_lea.vmem [#allocation11], %s2480_s12  ;;  %s1611_s20 = sshll.u32 %s2268_s25, 8 }
  0xb4   : > { %1734 = vmatprep.subr.bf16.mxu0 %v1733_v14  ;;  %v1741_v27 = vpack.c.bf16 %v395_v24, %v393_v23  ;;  %v394_v29 = vld [vmem:[#allocation5 + $0x70] sm:$0xff]  ;;  %v1575_v38 = vld [vmem:[%s2698_s1] ss:$0 sm:$0xff]  ;;  %vm2532_vm2 = vmpackc.low %vm491_vm1, %vm491_vm1  ;;  %s1434_s30 = sshll.u32 %s350_s24, 4  ;;  %s2648_s14 = scalar_lea.hbm %s2703_s6, %s1611_s20  ;;  %s2642_s30 = int_to_ptr.vmem [resolvable:$true] %s1434_s30 }
  0xb5   : > { %v1743_v30 = vpack.c.bf16 %v394_v29, %v392_v28  ;;  %v2544_v56 = vld [vmem:[%s317_s29 + $0x8] sm:$0xff]  ;;  %v2548_v58 = vld [vmem:[%s317_s29] sm:$0xff]  ;;  %s2655_s25 = scalar_lea.sflag [#allocation4], %s294_s11  ;;  %s2112_s19 = scalar_lea.vmem %s2642_s30, 256 }
  0xb6   : > { %361 = vadd.xlane.f32.xlu0 %v360_v5  ;;  %v482_v57 = vld [vmem:[#allocation8 + $0x8] sm:$0xff]  ;;  %v481_v59 = vld [vmem:[#allocation8] sm:$0xff]  ;;  %p2113_p4 = scmp.ne.s32.totalorder %s2642_s30, %s2112_s19  ;;  %p2747_p10 = scmp.ne.s32.totalorder %s2732_s15, 0 }
  0xb7   : > { %1736 = vmatpush1.bf16.msra.mxu0 %v1735_v17  ;;  %v484_v60 = vadd.f32 %v482_v57, %v2544_v56  ;;  %v483_v61 = vadd.f32 %v481_v59, %v2548_v58  ;;  %s2209_s7 = smov [#allocation11]  }
  0xb8   : > { %1738 = vmatprep.subr.bf16.mxu0 %v1737_v21  ;;  %p2114_p3 = pnand %p2113_p4, %p2747_p10  ;;  %s2116_s12 = sshll.u32 %s2209_s7, 4  ;;  %s2117_s12 = int_to_ptr.vmem [resolvable:$false] %s2116_s12 }
  0xb9   : > { %s2118_s26 = scalar_lea.vmem %s2117_s12, 512  ;;  %p2119_p0 = scmp.lt.s32.totalorder %s2642_s30, %s2117_s12 }
  0xba   : > { %p2115_p13 = pneg %p2114_p3  ;;  %p2120_p11 = scmp.lt.s32.totalorder %s2118_s26, %s2112_s19 }
  0xbb   : > { %1740 = vmatpush1.bf16.msra.mxu0 %v1739_v26 }
  0xbc   : > { %1742 = vmatprep.subr.bf16.mxu0 %v1741_v27  ;;  %p2121_p5 = por %p2120_p11, %p2119_p0 }
  0xbe   : > { %p2122_p2 = pnand %p2121_p5, %p2115_p13 }
  0xbf   : > { %1744 = vmatpush1.bf16.msra.mxu0 %v1743_v30 }
 0x13f   : > { %v359_v31 = vpop.xlane.xlu0 %358 }
 0x140   : > { %v364_v32 = vmul.f32 0.015625, %v359_v31 }
 0x142   : > { %v366_v33 = vadd.f32 1e-06, %v364_v32 }
 0x143   : > { %v362_v34 = vpop.xlane.xlu0 %361 }
 0x144   : > { %1932 = vrsqrt.f32 %v366_v33  ;;  %v365_v35 = vmul.f32 0.015625, %v362_v34 }
 0x146   : > { %v367_v36 = vadd.f32 1e-06, %v365_v35 }
 0x148   : > { %1934 = vrsqrt.f32 %v367_v36  ;;  %v680_v36 = vld [vmem:[#allocation8 + $0x18] sm:$0xff] }
 0x14e   : > { %v1933_v37 = vpop.eup %1932 }
 0x14f   : > { %v370_v39 = vmul.f32 %v1933_v37, %v2500_v0  ;;  %v679_v37 = vld [vmem:[#allocation8 + $0x10] sm:$0xff] }
 0x151   : > { %v378_v40 = vmul.f32 %v1575_v38, %v370_v39  ;;  %v681_v39 = vadd.f32 %v679_v37, %v2548_v58 }
 0x152   : > { %v1935_v41 = vpop.eup %1934 }
 0x153   : > { %1576 = vmatmul.mubr.msk.f32.vlgmr.msra.gmra.mrb[0].mxu0 %vm356_vm0, %v378_v40  ;;  %v371_v42 = vmul.f32 %v1935_v41, %v2502_v1 }
 0x154   : > { %472 = vmatprep.mubr.f32.mxu0 %v2201_v25 }
 0x155   : > { %v379_v43 = vmul.f32 %v1575_v38, %v371_v42  ;;  %v682_v38 = vadd.f32 %v680_v36, %v2544_v56 }
 0x157   : > { %1577 = vmatmul.mubr.msk.f32.gmra.mrb[2].mxu0 %vm356_vm0, %v379_v43 }
 0x226   : > { %v2517_v44 = vpop.f32.mrb[0].mxu0 }
 0x227   : > { %v470_v45 = vpop.f32.mrb[1].mxu0  ;;  %1658 = vmatprep.mubr.msk.f32.mxu0 %vm491_vm1, %v2517_v44 }
 0x22a   : > { %v2521_v46 = vpop.f32.mrb[2].mxu0 }
 0x22b   : > { %v476_v47 = vpop.f32.mrb[3].mxu0  ;;  %v2525_v48 = vpack.i.bf16 %v2521_v46, %v2517_v44 }
 0x22c   : > { %v1751_v49 = vpack.c.bf16 %v476_v47, %v470_v45  ;;  %v2527_v50 = vpack.i.bf16 %v476_v47, %v470_v45  ;;  %v886_v47 = vld [vmem:[#allocation8 + $0x20] sm:$0xff] }
 0x22d   : > { %1898 = vrot.lane.b32.xlu1 %v2525_v48, %s2202_s13 }
 0x22e   : > { %1752 = vmatprep.subr.bf16.mxu1 %v1751_v49 }
 0x22f   : > { %1754 = vmatpush3.bf16.msra.mxu1 %v1751_v49 }
 0x29f   : > { %v1899_v51 = vpop.permute.xlu1 %1898 }
 0x2a0   : > { %v1901_v52 = vunpack.i.h.bf16 %v1899_v51  ;;  %v1900_v53 = vunpack.i.l.bf16 %v1899_v51  ;;  %v887_v51 = vld [vmem:[#allocation8 + $0x28] sm:$0xff] }
 0x2a2   : > { %v1745_v55 = vpack.c.bf16 %v1901_v52, %v1900_v53  ;;  %v888_v52 = vadd.f32 %v886_v47, %v2548_v58  ;;  %v889_v53 = vadd.f32 %v887_v51, %v2544_v56 }
 0x2a4   : > { %1747 = vmatprep.subr.msk.bf16.mxu0 %vm2532_vm2, %v1745_v55 }
 0x2a5   : > { %1750 = vmatpush3.bf16.xpose.msk.msra.mxu0 %vm2532_vm2, %v1745_v55 }
 0x2ac   : > { %1659 = vmatmul.mubr.msk.f32.vlgmr.msra.gmra.mrb[4].mxu0 %vm491_vm1, %v2521_v46 }
 0x37f   : > { %v1660_v62 = vpop.f32.mrb[4].mxu0 }
 0x380   : > { %v572_v63 = vadd.f32 %v1660_v62, %v484_v60  ;;  %v566_v2 = vpop.f32.mrb[5].mxu0 }
 0x381   : > { %v567_v3 = vadd.f32 %v566_v2, %v483_v61 }
 0x382   : > { %v578_v4 = vsel %vm491_vm1, %v572_v63, -inf }
 0x383   : > { %579 = vmax.xlane.f32.xlu0 %v578_v4  ;;  %v575_v5 = vsel %vm491_vm1, %v567_v3, -inf }
 0x384   : > { %576 = vmax.xlane.f32.xlu1 %v575_v5 }
 0x395   : > { %683 = vrot.lane.b32.xlu1 %v2517_v44, %s2203_s18 }
 0x399   : > { %1903 = vrot.lane.b32.xlu0 %v2525_v48, %s2204_s9 }
 0x410   : > { %v580_v6 = vpop.xlane.xlu0 %579 }
 0x411   : > { %v582_v7 = vsub.f32 %v572_v63, %v580_v6  ;;  %v577_v8 = vpop.xlane.xlu1 %576 }
 0x412   : > { %v581_v9 = vsub.f32 %v567_v3, %v577_v8 }
 0x413   : > { %v585_v10 = vmul.f32 1.442695, %v582_v7 }
 0x414   : > { %v583_v11 = vmul.f32 1.442695, %v581_v9  ;;  %v1904_v12 = vpop.permute.xlu0 %1903 }
 0x415   : > { %1936 = vpow2.f32 %v585_v10  ;;  %v1906_v13 = vunpack.i.h.bf16 %v1904_v12  ;;  %v1905_v14 = vunpack.i.l.bf16 %v1904_v12  ;;  %v684_v29 = vpop.permute.xlu1 %683 }
 0x416   : > { %1938 = vpow2.f32 %v583_v11 }
 0x417   : > { %v1755_v15 = vpack.c.bf16 %v1906_v13, %v1905_v14 }
 0x419   : > { %1757 = vmatprep.subr.msk.bf16.mxu1 %vm2532_vm2, %v1755_v15 }
 0x41f   : > { %v1937_v16 = vpop.eup %1936 }
 0x420   : > { %v590_v17 = vsel %vm491_vm1, %v1937_v16, 0.0  ;;  %v1939_v18 = vpop.eup %1938 }
 0x421   : > { %591 = vadd.xlane.f32.xlu0 %v590_v17  ;;  %v587_v19 = vsel %vm491_vm1, %v1939_v18, 0.0 }
 0x425   : > { %588 = vadd.xlane.f32.xlu0 %v587_v19 }
 0x43b   : > { %1908 = vrot.lane.b32.xlu0 %v2525_v48, %s2205_s10 }
 0x43f   : > { %685 = vrot.lane.b32.xlu0 %v2521_v46, %s2203_s18 }
 0x443   : > { %890 = vrot.lane.b32.xlu0 %v2517_v44, %s2206_s17 }
 0x447   : > { %892 = vrot.lane.b32.xlu0 %v2521_v46, %s2206_s17 }
 0x4ae   : > { %v592_v20 = vpop.xlane.xlu0 %591 }
 0x4af   : > { %1940 = vrcp.f32 %v592_v20 }
 0x4b2   : > { %v589_v21 = vpop.xlane.xlu0 %588 }
 0x4b3   : > { %1942 = vrcp.f32 %v589_v21 }
 0x4b6   : > { %v1909_v22 = vpop.permute.xlu0 %1908 }
 0x4b7   : > { %v1911_v25 = vunpack.i.h.bf16 %v1909_v22  ;;  %v1910_v26 = vunpack.i.l.bf16 %v1909_v22 }
 0x4b9   : > { %v1941_v23 = vpop.eup %1940  ;;  %v1765_v30 = vpack.c.bf16 %v1911_v25, %v1910_v26 }
 0x4ba   : > { %v596_v28 = vmul.f32 %v1941_v23, %v1937_v16  ;;  %v686_v31 = vpop.permute.xlu0 %685 }
 0x4bd   : > { %v1943_v24 = vpop.eup %1942 }
 0x4be   : > { %v595_v27 = vmul.f32 %v1943_v24, %v1939_v18  ;;  %v891_v32 = vpop.permute.xlu0 %890 }
 0x4c0   : > { %1665 = vmatprep.mubr.msk.f32.mxu1 %vm491_vm1, %v595_v27 }
 0x4c1   : > { %1666 = vmatmul.mubr.msk.f32.vlgmr.msra.gmra.mrb[0].mxu1 %vm491_vm1, %v596_v28 }
 0x4c2   : > { %1760 = vmatpush3.bf16.xpose.msk.msra.mxu1 %vm2532_vm2, %v1755_v15  ;;  %1672 = vmatprep.mubr.msk.f32.mxu1 %vm491_vm1, %v684_v29  ;;  %v893_v33 = vpop.permute.xlu0 %892 }
 0x4c3   : > { %1767 = vmatprep.subr.msk.bf16.mxu1 %vm2532_vm2, %v1765_v30 }
 0x4c9   : > { %1673 = vmatmul.mubr.msk.f32.vlgmr.msra.gmra.mrb[2].mxu1 %vm491_vm1, %v686_v31 }
 0x4ca   : > { %1770 = vmatpush3.bf16.xpose.msk.msra.mxu1 %vm2532_vm2, %v1765_v30  ;;  %1686 = vmatprep.mubr.msk.f32.mxu1 %vm491_vm1, %v891_v32 }
 0x4d1   : > { %1687 = vmatmul.mubr.msk.f32.vlgmr.msra.gmra.mrb[4].mxu1 %vm491_vm1, %v893_v33 }
 0x594   : > { %v2582_v34 = vpop.f32.mrb[0].mxu1 }
 0x595   : > { %v2584_v35 = vpop.f32.mrb[1].mxu1 }
 0x59c   : > { %v1674_v40 = vpop.f32.mrb[2].mxu1 }
 0x59d   : > { %v771_v41 = vadd.f32 %v1674_v40, %v682_v38  ;;  %v765_v42 = vpop.f32.mrb[3].mxu1 }
 0x59e   : > { %v766_v43 = vadd.f32 %v765_v42, %v681_v39 }
 0x59f   : > { %v777_v45 = vsel %vm491_vm1, %v771_v41, -inf }
 0x5a0   : > { %778 = vmax.xlane.f32.xlu0 %v777_v45  ;;  %v774_v49 = vsel %vm491_vm1, %v766_v43, -inf }
 0x5a1   : > { %775 = vmax.xlane.f32.xlu1 %v774_v49 }
 0x5a4   : > { %v1688_v55 = vpop.f32.mrb[4].mxu1 }
 0x5a5   : > { %v972_v57 = vpop.f32.mrb[5].mxu1  ;;  %v978_v60 = vadd.f32 %v1688_v55, %v889_v53  ;;  %v1092_v55 = vld [vmem:[#allocation8 + $0x38] sm:$0xff] }
 0x5a6   : > { %v973_v59 = vadd.f32 %v972_v57, %v888_v52  ;;  %v1091_v57 = vld [vmem:[#allocation8 + $0x30] sm:$0xff] }
 0x5a7   : > { %v984_v62 = vsel %vm491_vm1, %v978_v60, -inf }
 0x5a8   : > { %v981_v61 = vsel %vm491_vm1, %v973_v59, -inf }
 0x5a9   : > { %982 = vmax.xlane.f32.xlu0 %v981_v61 }
 0x5ad   : > { %985 = vmax.xlane.f32.xlu0 %v984_v62 }
 0x5b2   : > { %1913 = vrot.lane.b32.xlu1 %v2527_v50, %s2203_s18 }
 0x62d   : > { %v779_v63 = vpop.xlane.xlu0 %778 }
 0x62e   : > { %v781_v2 = vsub.f32 %v771_v41, %v779_v63  ;;  %v776_v3 = vpop.xlane.xlu1 %775 }
 0x62f   : > { %v780_v4 = vsub.f32 %v766_v43, %v776_v3 }
 0x630   : > { %v784_v5 = vmul.f32 1.442695, %v781_v2 }
 0x631   : > { %v782_v6 = vmul.f32 1.442695, %v780_v4 }
 0x632   : > { %1944 = vpow2.f32 %v784_v5  ;;  %v1914_v7 = vpop.permute.xlu1 %1913 }
 0x633   : > { %1946 = vpow2.f32 %v782_v6  ;;  %v1916_v8 = vunpack.i.h.bf16 %v1914_v7  ;;  %v1915_v9 = vunpack.i.l.bf16 %v1914_v7 }
 0x635   : > { %v1761_v10 = vpack.c.bf16 %v1916_v8, %v1915_v9 }
 0x636   : > { %v983_v11 = vpop.xlane.xlu0 %982 }
 0x637   : > { %1762 = vmatprep.subr.bf16.mxu0 %v1761_v10  ;;  %v987_v21 = vsub.f32 %v973_v59, %v983_v11  ;;  %v1094_v59 = vadd.f32 %v1092_v55, %v2544_v56 }
 0x638   : > { %1764 = vmatpush3.bf16.msra.mxu0 %v1761_v10 }
 0x639   : > { %v989_v22 = vmul.f32 1.442695, %v987_v21 }
 0x63a   : > { %v986_v12 = vpop.xlane.xlu0 %985 }
 0x63b   : > { %v988_v13 = vsub.f32 %v978_v60, %v986_v12  ;;  %v1093_v60 = vadd.f32 %v1091_v57, %v2548_v58 }
 0x63c   : > { %v1945_v14 = vpop.eup %1944 }
 0x63d   : > { %v1947_v15 = vpop.eup %1946  ;;  %v991_v16 = vmul.f32 1.442695, %v988_v13  ;;  %v789_v17 = vsel %vm491_vm1, %v1945_v14, 0.0 }
 0x63e   : > { %790 = vadd.xlane.f32.xlu0 %v789_v17  ;;  %v786_v18 = vsel %vm491_vm1, %v1947_v15, 0.0 }
 0x63f   : > { %1948 = vpow2.f32 %v991_v16  ;;  %787 = vadd.xlane.f32.xlu1 %v786_v18 }
 0x640   : > { %1950 = vpow2.f32 %v989_v22  ;;  %v1328_v22 = vld [vmem:[#allocation7 + $0x8] sm:$0xff] }
 0x649   : > { %v1949_v19 = vpop.eup %1948 }
 0x64a   : > { %v996_v20 = vsel %vm491_vm1, %v1949_v19, 0.0  ;;  %v1951_v23 = vpop.eup %1950 }
 0x64b   : > { %997 = vadd.xlane.f32.xlu0 %v996_v20  ;;  %v993_v24 = vsel %vm491_vm1, %v1951_v23, 0.0 }
 0x650   : > { %1923 = vrot.lane.b32.xlu1 %v2525_v48, %s2207_s23 }
 0x654   : > { %1095 = vrot.lane.b32.xlu1 %v2517_v44, %s2208_s8 }
 0x661   : > { %1918 = vrot.lane.b32.xlu0 %v2527_v50, %s2206_s17 }
 0x678   : > { %994 = vadd.xlane.f32.xlu1 %v993_v24 }
 0x689   : > { %1097 = vrot.lane.b32.xlu1 %v2521_v46, %s2208_s8 }
 0x6cb   : > { %v791_v25 = vpop.xlane.xlu0 %790 }
 0x6cc   : > { %1952 = vrcp.f32 %v791_v25  ;;  %v788_v48 = vpop.xlane.xlu1 %787  ;;  %v1330_v25 = vld [vmem:[#allocation7 + $0x18] sm:$0xff] }
 0x6cd   : > { %1954 = vrcp.f32 %v788_v48 }
 0x6d0   : > { %v1924_v30 = vpop.permute.xlu1 %1923 }
 0x6d1   : > { %v1926_v32 = vunpack.i.h.bf16 %v1924_v30  ;;  %v1925_v33 = vunpack.i.l.bf16 %v1924_v30 }
 0x6d3   : > { %v1775_v38 = vpack.c.bf16 %v1926_v32, %v1925_v33 }
 0x6d4   : > { %v1096_v39 = vpop.permute.xlu1 %1095 }
 0x6d6   : > { %v1953_v26 = vpop.eup %1952 }
 0x6d7   : > { %v1955_v27 = vpop.eup %1954  ;;  %v795_v29 = vmul.f32 %v1953_v26, %v1945_v14  ;;  %v1331_v26 = vld [vmem:[#allocation7 + $0x20] sm:$0xff] }
 0x6d8   : > { %v998_v44 = vpop.xlane.xlu0 %997  ;;  %v794_v28 = vmul.f32 %v1955_v27, %v1947_v15  ;;  %v1332_v27 = vld [vmem:[#allocation7 + $0x28] sm:$0xff] }
 0x6d9   : > { %1956 = vrcp.f32 %v998_v44  ;;  %v1793_v44 = vpack.c.bf16 %v1332_v27, %v1331_v26 }
 0x6da   : > { %1679 = vmatprep.mubr.msk.f32.mxu0 %vm491_vm1, %v794_v28  ;;  %v1333_v28 = vld [vmem:[#allocation7 + $0x30] sm:$0xff] }
 0x6db   : > { %1680 = vmatmul.mubr.msk.f32.vlgmr.msra.gmra.mrb[6].mxu0 %vm491_vm1, %v795_v29  ;;  %v1334_v29 = vld [vmem:[#allocation7 + $0x38] sm:$0xff] }
 0x6dc   : > { %v1919_v31 = vpop.permute.xlu0 %1918  ;;  %v1797_v30 = vpack.c.bf16 %v1334_v29, %v1333_v28 }
 0x6dd   : > { %v1921_v36 = vunpack.i.h.bf16 %v1919_v31  ;;  %v1920_v37 = vunpack.i.l.bf16 %v1919_v31 }
 0x6df   : > { %v1771_v46 = vpack.c.bf16 %v1921_v36, %v1920_v37 }
 0x6e1   : > { %1772 = vmatprep.subr.bf16.mxu0 %v1771_v46 }
 0x6e2   : > { %1774 = vmatpush3.bf16.msra.mxu0 %v1771_v46 }
 0x6e3   : > { %1777 = vmatprep.subr.msk.bf16.mxu0 %vm2532_vm2, %v1775_v38  ;;  %v1957_v41 = vpop.eup %1956 }
 0x6e4   : > { %v1002_v45 = vmul.f32 %v1957_v41, %v1949_v19 }
 0x705   : > { %v995_v40 = vpop.xlane.xlu1 %994 }
 0x706   : > { %1958 = vrcp.f32 %v995_v40 }
 0x709   : > { %v1098_v47 = vpop.permute.xlu1 %1097 }
 0x710   : > { %v1959_v42 = vpop.eup %1958 }
 0x711   : > { %v1001_v43 = vmul.f32 %v1959_v42, %v1951_v23  ;;  %v1329_v23 = vld [vmem:[#allocation7 + $0x10] sm:$0xff] }
 0x712   : > { %v1789_v48 = vpack.c.bf16 %v1330_v25, %v1329_v23 }
 0x713   : > { %1693 = vmatprep.mubr.msk.f32.mxu0 %vm491_vm1, %v1001_v43 }
 0x714   : > { %1694 = vmatmul.mubr.msk.f32.vlgmr.msra.gmra.mrb[8].mxu0 %vm491_vm1, %v1002_v45 }
 0x715   : > { %1780 = vmatpush3.bf16.xpose.msk.msra.mxu0 %vm2532_vm2, %v1775_v38  ;;  %1700 = vmatprep.mubr.msk.f32.mxu0 %vm491_vm1, %v1096_v39 }
 0x71c   : > { %1701 = vmatmul.mubr.msk.f32.vlgmr.msra.gmra.mrb[10].mxu0 %vm491_vm1, %v1098_v47 }
 0x7ae   : > { %v1681_v49 = vpop.f32.mrb[6].mxu0 }
 0x7af   : > { %v876_v51 = vpop.f32.mrb[7].mxu0 }
 0x7e7   : > { %v1695_v52 = vpop.f32.mrb[8].mxu0 }
 0x7e8   : > { %v1081_v53 = vpop.f32.mrb[9].mxu0 }
 0x7ef   : > { %v1702_v61 = vpop.f32.mrb[10].mxu0 }
 0x7f0   : > { %v1183_v62 = vadd.f32 %v1702_v61, %v1094_v59  ;;  %v1177_v63 = vpop.f32.mrb[11].mxu0 }
 0x7f1   : > { %v1178_v54 = vadd.f32 %v1177_v63, %v1093_v60 }
 0x7f2   : > { %v1189_v2 = vsel %vm491_vm1, %v1183_v62, -inf }
 0x7f3   : > { %1190 = vmax.xlane.f32.xlu1 %v1189_v2  ;;  %v1186_v3 = vsel %vm491_vm1, %v1178_v54, -inf }
 0x7f4   : > { %1187 = vmax.xlane.f32.xlu0 %v1186_v3 }
 0x804   : > { %1297 = vrot.lane.b32.xlu1 %v876_v51, %s2207_s23 }
 0x808   : > { %1299 = vrot.lane.b32.xlu1 %v1681_v49, %s2207_s23 }
 0x80c   : > { %1305 = vrot.lane.b32.xlu1 %v1081_v53, %s2205_s10 }
 0x880   : > { %v1191_v4 = vpop.xlane.xlu1 %1190 }
 0x881   : > { %v1193_v56 = vsub.f32 %v1183_v62, %v1191_v4  ;;  %v1188_v5 = vpop.xlane.xlu0 %1187 }
 0x882   : > { %v1192_v58 = vsub.f32 %v1178_v54, %v1188_v5 }
 0x883   : > { %v1196_v6 = vmul.f32 1.442695, %v1193_v56 }
 0x884   : > { %v1194_v7 = vmul.f32 1.442695, %v1192_v58  ;;  %v1298_v33 = vpop.permute.xlu1 %1297 }
 0x885   : > { %1960 = vpow2.f32 %v1196_v6  ;;  %v1319_v38 = vsel %vm491_vm1, %v2584_v35, %v1298_v33 }
 0x886   : > { %1962 = vpow2.f32 %v1194_v7 }
 0x888   : > { %v1300_v36 = vpop.permute.xlu1 %1299 }
 0x889   : > { %v1320_v40 = vsel %vm491_vm1, %v2582_v34, %v1300_v36 }
 0x88c   : > { %v1306_v46 = vpop.permute.xlu1 %1305 }
 0x88d   : > { %v1322_v41 = vsel %vm1321_vm3, %v1319_v38, %v1306_v46 }
 0x88f   : > { %v1961_v8 = vpop.eup %1960 }
 0x890   : > { %v1201_v9 = vsel %vm491_vm1, %v1961_v8, 0.0  ;;  %v1963_v10 = vpop.eup %1962 }
 0x891   : > { %1202 = vadd.xlane.f32.xlu0 %v1201_v9  ;;  %v1198_v11 = vsel %vm491_vm1, %v1963_v10, 0.0 }
 0x895   : > { %1199 = vadd.xlane.f32.xlu0 %v1198_v11 }
 0x8ab   : > { %1928 = vrot.lane.b32.xlu0 %v2527_v50, %s2208_s8  ;;  %v1327_v50 = vld [vmem:[#allocation7] sm:$0xff] }
 0x8ac   : > { %v1785_v24 = vpack.c.bf16 %v1328_v22, %v1327_v50 }
 0x8af   : > { %1307 = vrot.lane.b32.xlu0 %v1695_v52, %s2205_s10 }
 0x91e   : > { %v1203_v12 = vpop.xlane.xlu0 %1202 }
 0x91f   : > { %1964 = vrcp.f32 %v1203_v12 }
 0x922   : > { %v1200_v13 = vpop.xlane.xlu0 %1199 }
 0x923   : > { %1966 = vrcp.f32 %v1200_v13 }
 0x926   : > { %v1929_v14 = vpop.permute.xlu0 %1928 }
 0x927   : > { %v1931_v15 = vunpack.i.h.bf16 %v1929_v14  ;;  %v1930_v16 = vunpack.i.l.bf16 %v1929_v14 }
 0x929   : > { %v1781_v17 = vpack.c.bf16 %v1931_v15, %v1930_v16  ;;  %v1965_v18 = vpop.eup %1964 }
 0x92a   : > { %v1207_v21 = vmul.f32 %v1965_v18, %v1961_v8  ;;  %v1308_v37 = vpop.permute.xlu0 %1307 }
 0x92b   : > { %1782 = vmatprep.subr.bf16.mxu1 %v1781_v17  ;;  %v1323_v43 = vsel %vm1321_vm3, %v1320_v40, %v1308_v37 }
 0x92c   : > { %1784 = vmatpush3.bf16.msra.mxu1 %v1781_v17 }
 0x92d   : > { %v1967_v19 = vpop.eup %1966  ;;  %1786 = vmatprep.subr.bf16.mxu1 %v1785_v24 }
 0x92e   : > { %v1206_v20 = vmul.f32 %v1967_v19, %v1963_v10 }
 0x930   : > { %1707 = vmatprep.mubr.msk.f32.mxu1 %vm491_vm1, %v1206_v20 }
 0x931   : > { %1708 = vmatmul.mubr.msk.f32.vlgmr.msra.gmra.mrb[6].mxu1 %vm491_vm1, %v1207_v21 }
 0x932   : > { %1788 = vmatpush3.bf16.msra.mxu1 %v1785_v24 }
 0x933   : > { %1790 = vmatprep.subr.bf16.mxu1 %v1789_v48 }
 0x936   : > { %1792 = vmatpush3.bf16.msra.mxu1 %v1789_v48 }
 0x937   : > { %1794 = vmatprep.subr.bf16.mxu1 %v1793_v44 }
 0x93a   : > { %1796 = vmatpush3.bf16.msra.mxu1 %v1793_v44 }
 0x93b   : > { %1798 = vmatprep.subr.bf16.mxu1 %v1797_v30 }
 0x93e   : > { %1800 = vmatpush3.bf16.msra.mxu1 %v1797_v30 }
 0xa04   : > { %v1709_v31 = vpop.f32.mrb[6].mxu1 }
 0xa05   : > { %1315 = vrot.lane.b32.xlu0 %v1709_v31, %s2204_s9  ;;  %v1286_v32 = vpop.f32.mrb[7].mxu1 }
 0xa06   : > { %1313 = vrot.lane.b32.xlu1 %v1286_v32, %s2204_s9 }
 0xa77   : > { %v1316_v39 = vpop.permute.xlu0 %1315 }
 0xa78   : > { %v1314_v42 = vpop.permute.xlu1 %1313  ;;  %v1326_v47 = vsel %vm1324_vm4, %v1323_v43, %v1316_v39 }
 0xa79   : > { %v1325_v45 = vsel %vm1324_vm4, %v1322_v41, %v1314_v42 }
 0xa7a   : > { %1726 = vmatprep.mubr.msk.f32.mxu1 %vm356_vm0, %v1325_v45 }
 0xa7b   : > { %1727 = vmatmul.mubr.msk.f32.vlgmr.msra.gmra.mrb[8].mxu1 %vm356_vm0, %v1326_v47 }
 0xb4e   : > { %v1728_v49 = vpop.f32.mrb[8].mxu1 }
 0xb4f   : > { %v1417_v34 = vadd.f32 %v1728_v49, %v2502_v1  ;;  %v1407_v35 = vpop.f32.mrb[9].mxu1 }
 0xb50   : > { %v1416_v51 = vadd.f32 %v1407_v35, %v2500_v0 }
 0xb51   : > { %1419 = vst.msk [vmem:[%s350_s24 + $0x8] sm:$0xff] %vm356_vm0, %v1417_v34 }
 0xb52   : > { %1418 = vst.msk [vmem:[%s350_s24] sm:$0xff] %vm356_vm0, %v1416_v51 }
 0xb53   : > { %2125 = shalt.err (!%p2122_p2)
}
 0xb54   : > { %s2126_s11 = scalar_lea.hbm %s2648_s14, 256  ;;  %s2130_s27 = scalar_lea.hbm %s2703_s6, 512 }
 0xb55   : > { %p2127_p9 = scmp.ne.s32.totalorder %s2648_s14, %s2126_s11  ;;  %p2131_p12 = scmp.lt.u32.totalorder %s2648_s14, %s2703_s6 }
 0xb56   : > { %p2132_p1 = scmp.lt.u32.totalorder %s2130_s27, %s2126_s11  ;;  %p2134_p4 = scmp.lt.u32.totalorder %s2126_s11, %s2648_s14 }
 0xb57   : > { %p2128_p7 = pnand %p2127_p9, %p2747_p10 }
 0xb58   : > { %p2133_p6 = por %p2132_p1, %p2131_p12 }
 0xb59   : > { %p2129_p8 = pneg %p2128_p7 }
 0xb5a   : > { %p2135_p3 = por %p2134_p4, %p2133_p6 }
 0xb5c   : > { %p2136_p13 = pnand %p2135_p3, %p2129_p8 }
 0xb5e   : > { %2139 = shalt.err (!%p2136_p13)
}
 0xb5f   : > { %s2210_s18 = smov 128   ;;  %s2211_s9 = smov 8  }
 0xb60   : > { %1817 = dma.vmem_to_hbm [thread:$0]  (%p2747_p10), %s2642_s30, 256, %s2648_s14, %s2655_s25, %s2210_s18, %s2210_s18, %s2211_s9  }
 0xb61 PF: > { %s2748_s10 = sld [smem:[#allocation19_spill]]  ;;  %s2749_s17 = sld [smem:[#allocation18_spill]] }
 0xb62   : > { %s1449_s23 = sand.u32 1, %s2178_s21  }
 0xb63   : > { %s1450_s8 = scalar_lea.sflag [#allocation4], %s1449_s23 }
 0xb67   : > { %p2750_p0 = scmp.ne.s32.totalorder %s2748_s10, 0  ;;  %p2751_p11 = scmp.ge.s32.totalorder %s2749_s17, 2 }
 0xb69   : > { %p1837_p5 = pnand %p2751_p11, %p2750_p0 }
 0xb6b   : > { %2173 = dma.done.wait (!%p1837_p5), %s1450_s8, 256  }
 0xb6c   : > { %2175 = vsyncadd (!%p1837_p5), %s1450_s8, 4294967040  ;;  %s2752_s24 = sld [smem:[#allocation20_spill]]  ;;  %s2753_s20 = sld [smem:[#allocation17_spill]] }
 0xb6d   : > { %s2754_s23 = sld [smem:[#allocation21_spill]]  ;;  %s2755_s21 = smov %s2182_s22 }
 0xb72   : > { %p21_p2 = scmp.ge.s32.totalorder %s2752_s24, 4   ;;  %s2756_s22 = smov %s2753_s20 }
 0xb74   :  { %23 = sbr.rel (!%p21_p2) target bundleno = 10 (0xa), region = 115 }
 0xb7b   :  { %1455 = vsyncpa [#allocation3], 1 }
 0xb7c   :  { %1457 = vsyncpa [#allocation3 + $0x1], 1 }
 0xb7d   :  { %1458 = vsyncpa [#allocation6], 1 }
 0xb7e   :  { %1459 = vsyncpa [#allocation9], 1 }
 0xb7f   :  { %1460 = vsyncpa [#allocation4], 1 }
 0xb80   :  { %1462 = vsyncpa [#allocation4 + $0x1], 1 }

</bundles_post_ra>
